<compile_context>
chip_gen: v7x
topology: tpu7x:2x2x1
jax: 0.10.0
libtpu: 0.0.40
codegen_flags: <defaults>
</compile_context>

<pallas_src>
import functools

import jax
import jax.numpy as jnp
from jax.experimental import pallas as pl
from jax.experimental.pallas import tpu as pltpu


def mlp_kernel(x_ref, w1_ref, b1_ref, w2_ref, b2_ref, o_ref):
    # x_ref: (C_in, tn) tile, NCHW layout, spatial positions on the lane axis.
    x = x_ref[...].astype(jnp.bfloat16)
    # fc1 (1x1 conv): (hidden, C_in) @ (C_in, tn) on the MXU, f32 accumulation.
    h = jnp.dot(w1_ref[...], x, preferred_element_type=jnp.float32)
    h = h + b1_ref[...]                         # bias-add in f32
    h = jnp.minimum(jnp.maximum(h, 0.0), 6.0)   # ReLU6 in f32
    # fc2 (1x1 conv): (C_out, hidden) @ (hidden, tn), bf16 in / f32 accumulate.
    y = jnp.dot(w2_ref[...], h.astype(jnp.bfloat16),
                preferred_element_type=jnp.float32)
    o_ref[...] = (y + b2_ref[...]).astype(o_ref.dtype)
    # TODO(synk): dropout is identity at p=0.0; a stochastic path would use
    # pltpu.prng_seed / pltpu.stateful_bernoulli inside this kernel.


def _vmem_budget_bytes():
    """Per-generation VMEM budget (leave headroom for compiler scratch)."""
    budget = 100 << 20                          # v5e / v6e: 128 MiB physical
    try:
        kind = jax.devices()[0].device_kind.lower()
        if "v7" in kind:
            budget = 52 << 20                   # v7x: 64 MiB physical per TC
    except Exception:
        pass
    return budget


def _pick_spatial_tile(hw, c_in, hidden, c_out, budget_bytes):
    """Largest lane-dense spatial tile whose working set fits the budget."""
    cands = sorted({hw} | {t for t in range(128, hw, 128) if hw % t == 0},
                   reverse=True)

    def vmem_est(tn):
        x_buf = 2 * c_in * tn * 4               # double-buffered x tile (f32)
        o_buf = 2 * c_out * tn * 4              # double-buffered out tile (f32)
        h_buf = hidden * tn * (4 + 2)           # f32 intermediate + bf16 copy
        w_buf = (hidden * c_in + c_out * hidden) * 2  # bf16 weights, 1 buffer
        b_buf = (hidden + c_out) * 4
        return x_buf + o_buf + h_buf + w_buf + b_buf

    for tn in cands:
        if vmem_est(tn) <= int(budget_bytes * 0.75):
            return tn
    return cands[-1]


def mlp_forward(x_nchw, params):
    """Forward pass of Mlp.  Input/output are NCHW (matching the PyTorch module)."""
    B, C_in, H, W = x_nchw.shape
    hidden = params["w1"].shape[0]
    C_out = params["w2"].shape[0]
    HW = H * W

    budget = _vmem_budget_bytes()
    tn = _pick_spatial_tile(HW, C_in, hidden, C_out, budget)
    n_tiles = pl.cdiv(HW, tn)

    # Contiguous reshape only: no transpose, no pad, no extra HBM pass.
    x3 = x_nchw.reshape(B, C_in, HW)

    # Grid-invariant operands: single-buffered, VMEM-resident across the grid.
    resident = functools.partial(pl.BlockSpec, pipeline_mode=pl.Buffered(1))

    out3 = pl.pallas_call(
        mlp_kernel,
        out_shape=jax.ShapeDtypeStruct((B, C_out, HW), jnp.float32),
        grid_spec=pltpu.PrefetchScalarGridSpec(
            num_scalar_prefetch=0,
            grid=(B, n_tiles),
            in_specs=[
                pl.BlockSpec((None, C_in, tn), lambda b, j: (b, 0, j)),  # x tile
                resident((hidden, C_in), lambda b, j: (0, 0)),           # W1 (bf16)
                resident((hidden, 1), lambda b, j: (0, 0)),              # b1 (f32)
                resident((C_out, hidden), lambda b, j: (0, 0)),          # W2 (bf16)
                resident((C_out, 1), lambda b, j: (0, 0)),               # b2 (f32)
            ],
            out_specs=pl.BlockSpec((None, C_out, tn), lambda b, j: (b, 0, j)),
        ),
        compiler_params=pltpu.CompilerParams(
            dimension_semantics=("parallel", "parallel"),  # megacore split
            vmem_limit_bytes=budget,
        ),
    )(x3, params["w1"], params["b1"], params["w2"], params["b2"])

    return out3.reshape(B, C_out, H, W)


def init_params(key, in_features, hidden_features, out_features):
    """Deterministic synthetic parameters (shapes match Mlp.__init__)."""
    k1, k2, k3, k4 = jax.random.split(key, 4)
    # Conv2d 1x1 weights in their native (C_out, C_in) layout; bf16 for the MXU.
    w1 = (jax.random.normal(k1, (hidden_features, in_features), jnp.float32)
          / float(in_features)).astype(jnp.bfloat16)
    b1 = 0.05 * jax.random.normal(k2, (hidden_features, 1), jnp.float32)
    w2 = (jax.random.normal(k3, (out_features, hidden_features), jnp.float32)
          / float(hidden_features)).astype(jnp.bfloat16)
    b2 = 0.05 * jax.random.normal(k4, (out_features, 1), jnp.float32)
    return {"w1": w1, "b1": b1, "w2": w2, "b2": b2}


def reference(x_nchw, params):
    """Pure-JAX f32 reference mirroring the PyTorch forward (drop=0.0)."""
    w1 = params["w1"].astype(jnp.float32)
    w2 = params["w2"].astype(jnp.float32)
    h = jnp.einsum("oc,bchw->bohw", w1, x_nchw) + params["b1"].reshape(1, -1, 1, 1)
    h = jnp.clip(h, 0.0, 6.0)                                   # ReLU6
    y = jnp.einsum("oc,bchw->bohw", w2, h) + params["b2"].reshape(1, -1, 1, 1)
    return y


if __name__ == "__main__":
    # Small shapes consistent with the module: batch=2, channels=4, spatial=16,
    # hidden=32, out=in (the Mlp default).
    B, C_in, H, W = 2, 4, 16, 16
    hidden, C_out = 32, C_in

    key = jax.random.PRNGKey(0)
    kx, kp = jax.random.split(key)
    x = jax.random.normal(kx, (B, C_in, H, W), jnp.float32)     # NCHW like PyTorch
    params = init_params(kp, C_in, hidden, C_out)

    out = jax.block_until_ready(mlp_forward(x, params))
    ref = jax.block_until_ready(reference(x, params))

    if out.shape != (B, C_out, H, W):
        raise AssertionError(f"bad output shape {out.shape}")
    # bf16 MXU inputs with f32 accumulation -> looser tolerance vs f32 reference.
    if not jnp.allclose(out, ref, rtol=2e-2, atol=2e-2):
        raise AssertionError("Pallas kernel does not match JAX reference")
    print("KERNEL_OK")
</pallas_src>

<mosaic_0001>
module attributes {stable_mosaic.version = 11 : i64} {
  func.func @mlp_kernel(%arg0: i32, %arg1: i32, %arg2: memref<1x4x256xf32, #tpu.memory_space<vmem>>, %arg3: memref<32x4xbf16, #tpu.memory_space<vmem>>, %arg4: memref<32x1xf32, #tpu.memory_space<vmem>>, %arg5: memref<4x32xbf16, #tpu.memory_space<vmem>>, %arg6: memref<4x1xf32, #tpu.memory_space<vmem>>, %arg7: memref<1x4x256xf32, #tpu.memory_space<vmem>>) attributes {dimension_semantics = [#tpu.dimension_semantics<parallel>, #tpu.dimension_semantics<parallel>], iteration_bounds = array<i64: 2, 1>, scalar_prefetch = 0 : i64, scratch_operands = 0 : i64, tpu.core_type = #tpu.core_type<tc>, window_params = [{transform_indices = @transform_0, window_bounds = array<i64: 1, 4, 256>}, {pipeline_mode = #tpu.pipeline_mode<synchronous>, transform_indices = @transform_1, window_bounds = array<i64: 32, 4>}, {pipeline_mode = #tpu.pipeline_mode<synchronous>, transform_indices = @transform_2, window_bounds = array<i64: 32, 1>}, {pipeline_mode = #tpu.pipeline_mode<synchronous>, transform_indices = @transform_3, window_bounds = array<i64: 4, 32>}, {pipeline_mode = #tpu.pipeline_mode<synchronous>, transform_indices = @transform_4, window_bounds = array<i64: 4, 1>}, {transform_indices = @transform_5, window_bounds = array<i64: 1, 4, 256>}]} {
    %c0 = arith.constant 0 : index
    %c0_0 = arith.constant 0 : index
    %c0_1 = arith.constant 0 : index
    %0 = vector.load %arg2[%c0, %c0_0, %c0_1] : memref<1x4x256xf32, #tpu.memory_space<vmem>>, vector<1x4x256xf32>
    %1 = vector.shape_cast %0 : vector<1x4x256xf32> to vector<4x256xf32>
    %2 = arith.truncf %1 : vector<4x256xf32> to vector<4x256xbf16>
    %c0_2 = arith.constant 0 : index
    %c0_3 = arith.constant 0 : index
    %3 = vector.load %arg3[%c0_2, %c0_3] : memref<32x4xbf16, #tpu.memory_space<vmem>>, vector<32x4xbf16>
    %cst = arith.constant dense<0.000000e+00> : vector<32x256xf32>
    %4 = tpu.matmul %3, %2, %cst {dimension_numbers = #tpu.dot_dimension_numbers<[1], [0], [0], [1], [0, 0, 1, 1], [], []>} : vector<32x4xbf16>, vector<4x256xbf16>, vector<32x256xf32> -> vector<32x256xf32>
    %c0_4 = arith.constant 0 : index
    %c0_5 = arith.constant 0 : index
    %5 = vector.load %arg4[%c0_4, %c0_5] : memref<32x1xf32, #tpu.memory_space<vmem>>, vector<32x1xf32>
    %6 = vector.broadcast %5 : vector<32x1xf32> to vector<32x256xf32>
    %7 = arith.addf %4, %6 : vector<32x256xf32>
    %cst_6 = arith.constant 0.000000e+00 : f32
    %8 = vector.broadcast %cst_6 : f32 to vector<32x256xf32>
    %9 = arith.maximumf %7, %8 : vector<32x256xf32>
    %cst_7 = arith.constant 6.000000e+00 : f32
    %10 = vector.broadcast %cst_7 : f32 to vector<32x256xf32>
    %11 = arith.minimumf %9, %10 : vector<32x256xf32>
    %c0_8 = arith.constant 0 : index
    %c0_9 = arith.constant 0 : index
    %12 = vector.load %arg5[%c0_8, %c0_9] : memref<4x32xbf16, #tpu.memory_space<vmem>>, vector<4x32xbf16>
    %13 = arith.truncf %11 : vector<32x256xf32> to vector<32x256xbf16>
    %cst_10 = arith.constant dense<0.000000e+00> : vector<4x256xf32>
    %14 = tpu.matmul %12, %13, %cst_10 {dimension_numbers = #tpu.dot_dimension_numbers<[1], [0], [0], [1], [0, 0, 1, 1], [], []>} : vector<4x32xbf16>, vector<32x256xbf16>, vector<4x256xf32> -> vector<4x256xf32>
    %c0_11 = arith.constant 0 : index
    %c0_12 = arith.constant 0 : index
    %15 = vector.load %arg6[%c0_11, %c0_12] : memref<4x1xf32, #tpu.memory_space<vmem>>, vector<4x1xf32>
    %16 = vector.broadcast %15 : vector<4x1xf32> to vector<4x256xf32>
    %17 = arith.addf %14, %16 : vector<4x256xf32>
    %c0_13 = arith.constant 0 : index
    %c0_14 = arith.constant 0 : index
    %c0_15 = arith.constant 0 : index
    %18 = vector.load %arg7[%c0_13, %c0_14, %c0_15] : memref<1x4x256xf32, #tpu.memory_space<vmem>>, vector<1x4x256xf32>
    %19 = vector.shape_cast %18 : vector<1x4x256xf32> to vector<4x256xf32>
    %20 = vector.shape_cast %17 : vector<4x256xf32> to vector<1x4x256xf32>
    tpu.vector_store %arg7[%c0_13, %c0_14, %c0_15], %20 {strides = array<i32>} : memref<1x4x256xf32, #tpu.memory_space<vmem>>, vector<1x4x256xf32>,
    return
  }
  func.func @transform_0(%arg0: i32, %arg1: i32) -> (i32, i32, i32) {
    %c0_i32 = arith.constant 0 : i32
    %c0_i32_0 = arith.constant 0 : i32
    return %arg0, %c0_i32, %arg1 : i32, i32, i32
  }
  func.func @transform_1(%arg0: i32, %arg1: i32) -> (i32, i32) {
    %c0_i32 = arith.constant 0 : i32
    %c0_i32_0 = arith.constant 0 : i32
    %c0_i32_1 = arith.constant 0 : i32
    return %c0_i32, %c0_i32_0 : i32, i32
  }
  func.func @transform_2(%arg0: i32, %arg1: i32) -> (i32, i32) {
    %c0_i32 = arith.constant 0 : i32
    %c0_i32_0 = arith.constant 0 : i32
    %c0_i32_1 = arith.constant 0 : i32
    return %c0_i32, %c0_i32_0 : i32, i32
  }
  func.func @transform_3(%arg0: i32, %arg1: i32) -> (i32, i32) {
    %c0_i32 = arith.constant 0 : i32
    %c0_i32_0 = arith.constant 0 : i32
    %c0_i32_1 = arith.constant 0 : i32
    return %c0_i32, %c0_i32_0 : i32, i32
  }
  func.func @transform_4(%arg0: i32, %arg1: i32) -> (i32, i32) {
    %c0_i32 = arith.constant 0 : i32
    %c0_i32_0 = arith.constant 0 : i32
    %c0_i32_1 = arith.constant 0 : i32
    return %c0_i32, %c0_i32_0 : i32, i32
  }
  func.func @transform_5(%arg0: i32, %arg1: i32) -> (i32, i32, i32) {
    %c0_i32 = arith.constant 0 : i32
    %c0_i32_0 = arith.constant 0 : i32
    return %arg0, %c0_i32, %arg1 : i32, i32, i32
  }
}

</mosaic_0001>

<bundles_post_ra>
// kernel: tpu_custom_call.1
= control target key start
LH: loop header
LB: loop body
LE: loop exit
PB: predicated region body
PF: predicated region fallthrough
CT: control target
= control target key end

     0   :  { %10 = vsyncpa [#allocation3], 0  ;;  %s1361_s0 = inlined_call_operand.hbm [shape: f32[2,4,256], index: 0, kind: input, shape index: {}]   ;;  %s1362_s1 = inlined_call_operand.hbm [shape: bf16[32,4], index: 1, kind: input, shape index: {}]   ;;  %s1363_s2 = inlined_call_operand.hbm [shape: f32[32,1], index: 2, kind: input, shape index: {}]   ;;  %s1364_s3 = inlined_call_operand.hbm [shape: bf16[4,32], index: 3, kind: input, shape index: {}]   ;;  %s1365_s4 = inlined_call_operand.hbm [shape: f32[4,1], index: 4, kind: input, shape index: {}]   ;;  %s1366_s5 = inlined_call_operand.hbm [shape: f32[2,4,256], index: 5, kind: output, shape index: {}]  }
   0x1   :  { %12 = vsyncpa [#allocation3 + $0x1], 0 }
   0x2   :  { %13 = vsyncpa [#allocation6], 0 }
   0x3   :  { %14 = vsyncpa [#allocation9], 0 }
   0x4   :  { %15 = vsyncpa [#allocation4], 0 }
   0x5   :  { %17 = vsyncpa [#allocation4 + $0x1], 0  ;;  %s1062_s18 = smov 0   ;;  %s1064_s19 = smov 0  }
   0x6   :  { %s1066_s20 = smov 0   ;;  %s1068_s21 = smov 0  }
   0x7   :  { %s1070_s22 = smov 0   ;;  %s1072_s23 = smov 0  }
   0x8 LB: > { %s643_s24 = sadd.s32 4294967295, %s1019_s23   ;;  %p645_p0 = scmp.ge.s32.totalorder %s1019_s23, 1  ;;  %s1019_s23 = sphi %s1072_s23, %s23_s23   ;;  %s1015_s22 = sphi %s1070_s22, %s1390_s22   ;;  %s1011_s21 = sphi %s1068_s21, %s1389_s21   ;;  %s1007_s20 = sphi %s1066_s20, %s1388_s20   ;;  %s1003_s19 = sphi %s1064_s19, %s1387_s19   ;;  %s999_s18 = sphi %s1062_s18, %s1386_s18  }
   0x9   : > { %p1096_p1 = scmp.eq.s32.totalorder %s643_s24, 0  ;;  %p180_p2 = scmp.lt.s32.totalorder %s1019_s23, 3 }
   0xa   : > { %s1021_s27 = smov [#allocation5]   ;;  %s1022_s30 = smov [#allocation8]  }
   0xb   : > { %s1371_s25 = scalar_select %p1096_p1, 1, 0 }
   0xc   : > { %p1101_p3 = pnand %p645_p0, %p180_p2  ;;  %s192_s28 = sshll.u32 %s1021_s27, 4  ;;  %s1105_s28 = int_to_ptr.vmem [resolvable:$true] %s192_s28 }
   0xd   : > { %s219_s6 = sshll.u32 %s1022_s30, 4  ;;  %s1023_s7 = smov [#allocation7]   ;;  %s1116_s6 = int_to_ptr.vmem [resolvable:$true] %s219_s6 }
   0xe   : > { %s1372_s26 = scalar_select %p1101_p3, 1, 0 }
   0xf   : > { %p694_p4 = pneg %p1101_p3  ;;  %s1118_s8 = sshll.u32 %s1023_s7, 4  ;;  %s206_s8 = int_to_ptr.vmem [resolvable:$true] %s1118_s8 }
  0x10   : > { %s787_s11 = scalar_lea.hbm %s1362_s1, 256 }
  0x11   : > { %p1112_p6 = pnand %p694_p4, %p1096_p1  ;;  %p788_p7 = scmp.ne.s32.totalorder %s1362_s1, %s787_s11 }
  0x12   : > { %p794_p11 = scmp.lt.u32.totalorder %s787_s11, %s1362_s1 }
  0x13   : > { %p1128_p8 = pneg %p1112_p6 }
  0x15   : > { %p790_p9 = pnand %p1128_p8, %p788_p7 }
  0x17   : > { %p791_p10 = pneg %p790_p9 }
  0x19   : > { %p796_p12 = pnand %p794_p11, %p791_p10 }
  0x1b   : > { %799 = shalt.err (!%p796_p12)
}
  0x1c   : > { %s800_s17 = scalar_lea.vmem %s1105_s28, 256  ;;  %p808_p4 = scmp.lt.s32.totalorder %s1105_s28, %s1105_s28 }
  0x1d   : > { %p801_p13 = scmp.ne.s32.totalorder %s1105_s28, %s800_s17  ;;  %p809_p5 = scmp.lt.s32.totalorder %s800_s17, %s800_s17 }
  0x1f   : > { %p803_p0 = pnand %p801_p13, %p1128_p8  ;;  %p810_p7 = por %p809_p5, %p808_p4 }
  0x21   : > { %p804_p2 = pneg %p803_p0 }
  0x23   : > { %p811_p9 = pnand %p810_p7, %p804_p2 }
  0x25   : > { %814 = shalt.err (!%p811_p9)
}
  0x26   : > { %s1024_s27 = smov 64   ;;  %s1025_s30 = smov 4  }
  0x27   : > { %697 = dma.hbm_to_vmem [thread:$0]  (!%p1112_p6), %s1362_s1, 256, %s1105_s28, [#allocation6], %s1024_s27, %s1024_s27, %s1025_s30  }
  0x28   : > { %s815_s12 = scalar_lea.hbm %s1364_s3, 32 }
  0x29   : > { %p816_p5 = scmp.ne.s32.totalorder %s1364_s3, %s815_s12  ;;  %p822_p12 = scmp.lt.u32.totalorder %s815_s12, %s1364_s3 }
  0x2b   : > { %p818_p10 = pnand %p816_p5, %p1128_p8 }
  0x2d   : > { %p819_p11 = pneg %p818_p10 }
  0x2f   : > { %p824_p13 = pnand %p822_p12, %p819_p11 }
  0x31   : > { %827 = shalt.err (!%p824_p13)
}
  0x32   : > { %s828_s28 = scalar_lea.vmem %s1116_s6, 32  ;;  %p836_p7 = scmp.lt.s32.totalorder %s1116_s6, %s1116_s6 }
  0x33   : > { %p829_p0 = scmp.ne.s32.totalorder %s1116_s6, %s828_s28  ;;  %p837_p9 = scmp.lt.s32.totalorder %s828_s28, %s828_s28 }
  0x35   : > { %p831_p2 = pnand %p829_p0, %p1128_p8  ;;  %p838_p5 = por %p837_p9, %p836_p7 }
  0x37   : > { %p832_p4 = pneg %p831_p2 }
  0x39   : > { %p839_p10 = pnand %p838_p5, %p832_p4 }
  0x3b   : > { %842 = shalt.err (!%p839_p10)
}
  0x3c   : > { %703 = dma.hbm_to_vmem [thread:$0]  (!%p1112_p6), %s1364_s3, 32, %s1116_s6, [#allocation9]  }
  0x3d   : > { %s843_s10 = scalar_lea.hbm %s1363_s2, 512 }
  0x3e   : > { %p844_p11 = scmp.ne.s32.totalorder %s1363_s2, %s843_s10  ;;  %p850_p0 = scmp.lt.u32.totalorder %s843_s10, %s1363_s2 }
  0x40   : > { %p846_p12 = pnand %p844_p11, %p1128_p8 }
  0x42   : > { %p847_p13 = pneg %p846_p12 }
  0x44   : > { %p852_p2 = pnand %p850_p0, %p847_p13 }
  0x46   : > { %855 = shalt.err (!%p852_p2)
}
  0x47   : > { %s856_s16 = scalar_lea.vmem %s206_s8, 512  ;;  %p864_p5 = scmp.lt.s32.totalorder %s206_s8, %s206_s8 }
  0x48   : > { %p857_p4 = scmp.ne.s32.totalorder %s206_s8, %s856_s16  ;;  %p865_p10 = scmp.lt.s32.totalorder %s856_s16, %s856_s16 }
  0x4a   : > { %p859_p7 = pnand %p857_p4, %p1128_p8  ;;  %p866_p3 = por %p865_p10, %p864_p5 }
  0x4c   : > { %p860_p9 = pneg %p859_p7 }
  0x4e   : > { %p867_p1 = pnand %p866_p3, %p860_p9 }
  0x50   : > { %870 = shalt.err (!%p867_p1)
}
  0x51   : > { %s1026_s6 = smov 128   ;;  %s1027_s17 = smov 8  }
  0x52   : > { %700 = dma.hbm_to_vmem [thread:$0]  (!%p1112_p6), %s1363_s2, 512, %s206_s8, [#allocation6], %s1026_s6, %s1026_s6, %s1027_s17  }
  0x53   : > { %s1028_s30 = smov [#allocation10]   ;;  %s871_s11 = scalar_lea.hbm %s1365_s4, 64 }
  0x54   : > { %s230_s7 = sshll.u32 %s1028_s30, 4  ;;  %p872_p1 = scmp.ne.s32.totalorder %s1365_s4, %s871_s11  ;;  %s231_s7 = int_to_ptr.vmem [resolvable:$true] %s230_s7 }
  0x55   : > { %p878_p12 = scmp.lt.u32.totalorder %s871_s11, %s1365_s4 }
  0x56   : > { %p874_p3 = pnand %p872_p1, %p1128_p8 }
  0x58   : > { %p875_p11 = pneg %p874_p3 }
  0x5a   : > { %p880_p13 = pnand %p878_p12, %p875_p11 }
  0x5c   : > { %883 = shalt.err (!%p880_p13)
}
  0x5d   : > { %s884_s8 = scalar_lea.vmem %s231_s7, 64  ;;  %p892_p7 = scmp.lt.s32.totalorder %s231_s7, %s231_s7 }
  0x5e   : > { %p885_p0 = scmp.ne.s32.totalorder %s231_s7, %s884_s8  ;;  %p893_p9 = scmp.lt.s32.totalorder %s884_s8, %s884_s8 }
  0x60   : > { %p887_p2 = pnand %p885_p0, %p1128_p8  ;;  %p894_p5 = por %p893_p9, %p892_p7 }
  0x62   : > { %p888_p4 = pneg %p887_p2 }
  0x64   : > { %p895_p10 = pnand %p894_p5, %p888_p4 }
  0x66   : > { %898 = shalt.err (!%p895_p10)
}
  0x67   : > { %706 = dma.hbm_to_vmem [thread:$0]  (!%p1112_p6), %s1365_s4, 64, %s231_s7, [#allocation9]  }
  0x68   : > { %s644_s14 = sadd.s32 4294967294, %s1019_s23   ;;  %s35_s28 = sadd.s32 1, %s1015_s22 }
  0x69   : > { %p37_p8 = scmp.ge.s32.totalorder %s35_s28, 2  ;;  %s44_s29 = sadd.s32 1, %s1007_s20 }
  0x6a   : > { %p51_p1 = scmp.ne.s32.totalorder %s1007_s20, %s1003_s19  ;;  %p52_p3 = scmp.eq.s32.totalorder %s1019_s23, 0 }
  0x6b   : > { %s1392_s28 = smov (%p37_p8, %s35_s28), 0  ;;  %p57_p12 = scmp.ne.s32.totalorder %s1003_s19, %s999_s18 }
  0x6c   : > { %p1217_p11 = por %p52_p3, %p51_p1  ;;  %s39_s30 = ssub.s32 %s1015_s22, %s1392_s28 }
  0x6d   : > { %p167_p6 = scmp.eq.s32.totalorder %s643_s24, 1  ;;  %p42_p13 = scmp.eq.s32.totalorder %s39_s30, 0 }
  0x6e   : > { %p1376_p0 = scmp.ne.s32.totalorder %s1371_s25, 0  ;;  %p173_p7 = scmp.eq.s32.totalorder %s644_s14, 1 }
  0x6f   : > { %p1233_p4 = por %p167_p6, %p51_p1  ;;  %p719_p5 = scmp.lt.s32.totalorder %s1019_s23, 2 }
  0x70   : > { %p1229_p2 = por %p1376_p0, %p57_p12  ;;  %p1240_p9 = por %p173_p7, %p57_p12 }
  0x71   : > { %s1378_s9 = scalar_select %p1233_p4, 1, 0 }
  0x72   : > { %s1238_s10 = scalar_select %p42_p13, %s1007_s20, %s44_s29  }
  0x73   : > { %s1379_s11 = scalar_select %p1240_p9, 1, 0 }
  0x74   : > { %s241_s12 = sand.u32 1, %s1007_s20   ;;  %s672_s24 = sshll.u32 %s1015_s22, 7 }
  0x75   : > { %s651_s13 = sshll.u32 %s241_s12, 3  ;;  %s1250_s8 = scalar_lea.hbm %s1361_s0, %s672_s24 }
  0x76   : > { %s245_s6 = scalar_lea.vmem [#allocation2], %s651_s13  ;;  %p1254_p10 = pnand %p719_p5, %p1217_p11 }
  0x77   : > { %s255_s17 = sshll.u32 %s245_s6, 4  ;;  %s242_s29 = scalar_lea.sflag [#allocation3], %s241_s12  ;;  %s1258_s17 = int_to_ptr.vmem [resolvable:$true] %s255_s17 }
  0x78   : > { %s899_s30 = scalar_lea.hbm %s1250_s8, 128  ;;  %p901_p1 = pneg %p1254_p10 }
  0x79   : > { %p900_p8 = scmp.ne.s32.totalorder %s1250_s8, %s899_s30  ;;  %s904_s27 = scalar_lea.hbm %s1361_s0, 256 }
  0x7a   : > { %p905_p11 = scmp.lt.u32.totalorder %s1250_s8, %s1361_s0  ;;  %p906_p6 = scmp.lt.u32.totalorder %s904_s27, %s899_s30 }
  0x7b   : > { %p902_p3 = pnand %p901_p1, %p900_p8  ;;  %p908_p0 = scmp.lt.u32.totalorder %s899_s30, %s1250_s8 }
  0x7c   : > { %p907_p13 = por %p906_p6, %p905_p11 }
  0x7d   : > { %p903_p12 = pneg %p902_p3 }
  0x7e   : > { %p909_p7 = por %p908_p0, %p907_p13 }
  0x80   : > { %p910_p5 = pnand %p909_p7, %p903_p12 }
  0x82   : > { %913 = shalt.err (!%p910_p5)
}
  0x83   : > { %s914_s12 = scalar_lea.vmem %s1258_s17, 128  ;;  %s1029_s6 = smov [#allocation2]  }
  0x84   : > { %p915_p8 = scmp.ne.s32.totalorder %s1258_s17, %s914_s12  ;;  %s919_s24 = sshll.u32 %s1029_s6, 4  ;;  %s920_s24 = int_to_ptr.vmem [resolvable:$false] %s919_s24 }
  0x85   : > { %s921_s13 = scalar_lea.vmem %s920_s24, 256  ;;  %p922_p4 = scmp.lt.s32.totalorder %s1258_s17, %s920_s24 }
  0x86   : > { %p917_p3 = pnand %p915_p8, %p901_p1  ;;  %p923_p11 = scmp.lt.s32.totalorder %s921_s13, %s914_s12 }
  0x88   : > { %p918_p9 = pneg %p917_p3  ;;  %p924_p6 = por %p923_p11, %p922_p4 }
  0x8a   : > { %p925_p13 = pnand %p924_p6, %p918_p9 }
  0x8c   : > { %928 = shalt.err (!%p925_p13)
}
  0x8d   : > { %710 = dma.hbm_to_vmem [thread:$0]  (!%p1254_p10), %s1250_s8, 128, %s1258_s17, %s242_s29  }
  0x8e   : > { %p1381_p12 = scmp.ne.s32.totalorder %s1372_s26, 0 }
  0x8f   : > { %s1288_s30 = sand.u32 (!%p1381_p12), 1, %s1003_s19  }
  0x90   : > { %264 = sbr.rel (%p1381_p12) target bundleno = 632 (0x278), region = 40  ;;  %s655_s27 = sshll.u32 (!%p1381_p12), %s1288_s30, 3 }
  0x91   : > { %s267_s15 = scalar_lea.sflag (!%p1381_p12), [#allocation3], %s1288_s30  ;;  %s270_s16 = scalar_lea.vmem (!%p1381_p12), [#allocation2], %s655_s27 }
  0x97   : > { %982 = dma.done.wait (%p1229_p2), %s267_s15, 128  }
  0x98   : > { %984 = vsyncadd (%p1229_p2), %s267_s15, 4294967168  ;;  %p1382_p4 = scmp.ne.s32.totalorder %s1371_s25, 0 }
  0x9a   : > { %986 = dma.done.wait (%p1382_p4), [#allocation6], 768  }
  0x9b   : > { %988 = vsyncadd (%p1382_p4), [#allocation6], 4294966528 }
  0x9c   : > { %990 = dma.done.wait (%p1382_p4), [#allocation9], 96  }
  0x9d   : > { %992 = vsyncadd (%p1382_p4), [#allocation9], 4294967200  ;;  %v1030_v0 = vmov 0   ;;  %v316_v1 = vld [vmem:[%s270_s16] sm:$0xff]  ;;  %vm367_vm0 = vcmask 1041408   ;;  %v328_v7 = vld [vmem:[#allocation7 + $0x10] sm:$0xff] }
  0x9e   : > { %406 = vmatprep.mubr.bf16.mxu0 %v1030_v0  ;;  %782 = vset.pattern.permute.xlu0 %v1030_v0  ;;  %v318_v2 = vcombine.high %v316_v1, %v316_v1  ;;  %v320_v3 = vpack.c.bf16 %v316_v1, %v316_v1  ;;  %v326_v4 = vld [vmem:[#allocation7] sm:$0xff]  ;;  %v327_v8 = vld [vmem:[#allocation7 + $0x8] sm:$0xff]  ;;  %v785_v9 = vld [vmem:[#allocation5] sm:$0xff]   ;;  %vm360_vm1 = vcmask 31744   ;;  %vm454_vm2 = vcmask 261120   ;;  %s673_s25 = sshll.u32 %s1011_s21, 7 }
  0x9f   : > { %783 = vset.pattern.permute.xlu1 %v1030_v0  ;;  %490 = vmatprep.mubr.bf16.mxu1 %v1030_v0  ;;  %v329_v10 = vld [vmem:[#allocation7 + $0x18] sm:$0xff]  ;;  %v448_v11 = vld [vmem:[#allocation10] sm:$0xf]  ;;  %v443_v53 = vld [vmem:[#allocation8] sm:$0x3]  ;;  %s312_s26 = scalar_lea.vmem [#allocation11], %s655_s27  ;;  %s1312_s14 = scalar_lea.hbm %s1366_s5, %s673_s25 }
  0xa0   : > { %v321_v5 = vpack.c.bf16 %v318_v2, %v318_v2  ;;  %v369_v6 = vsel %vm367_vm0, %v320_v3, 0  ;;  %332 = vperm.xlu0 %782, %v326_v4   ;;  %342 = vperm.xlu1 %783, %v328_v7   ;;  %v786_v12 = vld [vmem:[#allocation5 + $0x8] sm:$0xff]   ;;  %s521_s7 = sshll.u32 %s312_s26, 4  ;;  %s505_s29 = scalar_lea.sflag [#allocation4], %s1288_s30  ;;  %s1314_s7 = int_to_ptr.vmem [resolvable:$true] %s521_s7 }
  0xa1   : > { %s929_s21 = scalar_lea.vmem %s1314_s7, 128  ;;  %p1383_p9 = scmp.ne.s32.totalorder %s1378_s9, 0 }
  0xa2   : > { %663 = vmatprep.subr.msk.bf16.mxu0 %vm367_vm0, %v321_v5  ;;  %p930_p2 = scmp.ne.s32.totalorder %s1314_s7, %s929_s21  ;;  %s1031_s12 = smov [#allocation11]  }
  0xa3   : > { %375 = vmatpush1.bf16.msra.mxu0 %v369_v6  ;;  %s933_s6 = sshll.u32 %s1031_s12, 4  ;;  %s934_s6 = int_to_ptr.vmem [resolvable:$false] %s933_s6 }
  0xa4   : > { %337 = vperm.xlu0 %782, %v327_v8   ;;  %347 = vperm.xlu1 %783, %v329_v10   ;;  %p931_p10 = pnand %p930_p2, %p1383_p9  ;;  %s935_s24 = scalar_lea.vmem %s934_s6, 256 }
  0xa5   : > { %p936_p0 = scmp.lt.s32.totalorder %s1314_s7, %s934_s6  ;;  %p937_p7 = scmp.lt.s32.totalorder %s935_s24, %s929_s21 }
  0xa6   : > { %664 = vmatmul.mubr.msk.bf16.vlgmr.msra.gmra.mrb[0].mxu0 %vm360_vm1, %v785_v9  ;;  %p932_p1 = pneg %p931_p10 }
  0xa7   : > { %416 = vmatprep.mubr.bf16.mxu0 %v1030_v0  ;;  %p938_p5 = por %p937_p7, %p936_p0 }
  0xa8   : > { %451 = vperm.xlu0 %782, %v448_v11  }
  0xa9   : > { %p939_p8 = pnand %p938_p5, %p932_p1 }
  0xae   : > { %665 = vmatmul.mubr.msk.bf16.gmra.mrb[4].mxu0 %vm360_vm1, %v786_v12 }
 0x11f   : > { %v333_v13 = vpop.permute.xlu0 %332  ;;  %v343_v24 = vpop.permute.xlu1 %342 }
 0x123   : > { %v338_v17 = vpop.permute.xlu0 %337  ;;  %v348_v36 = vpop.permute.xlu1 %347 }
 0x127   : > { %v452_v54 = vpop.permute.xlu0 %451 }
 0x179   : > { %v408_v14 = vpop.f32.mrb[0].mxu0 }
 0x17a   : > { %v409_v15 = vadd.f32 %v408_v14, %v333_v13  ;;  %v410_v16 = vpop.f32.mrb[1].mxu0 }
 0x17b   : > { %v411_v18 = vadd.f32 %v410_v16, %v333_v13  ;;  %v412_v19 = vpop.f32.mrb[2].mxu0 }
 0x17c   : > { %v427_v20 = vmax.f32 %v409_v15, 0.0  ;;  %v413_v21 = vadd.f32 %v412_v19, %v338_v17  ;;  %v414_v22 = vpop.f32.mrb[3].mxu0 }
 0x17d   : > { %v428_v23 = vmax.f32 %v411_v18, 0.0  ;;  %v415_v25 = vadd.f32 %v414_v22, %v338_v17 }
 0x17e   : > { %v429_v26 = vmax.f32 %v413_v21, 0.0  ;;  %v435_v28 = vmin.f32 %v427_v20, 6.0 }
 0x17f   : > { %v430_v27 = vmax.f32 %v415_v25, 0.0  ;;  %v436_v30 = vmin.f32 %v428_v23, 6.0 }
 0x180   : > { %v437_v29 = vmin.f32 %v429_v26, 6.0 }
 0x181   : > { %v438_v31 = vmin.f32 %v430_v27, 6.0  ;;  %v418_v32 = vpop.f32.mrb[4].mxu0 }
 0x182   : > { %v419_v33 = vadd.f32 %v418_v32, %v343_v24  ;;  %v420_v34 = vpop.f32.mrb[5].mxu0  ;;  %v444_v35 = vpack.c.bf16 %v437_v29, %v435_v28 }
 0x183   : > { %v421_v37 = vadd.f32 %v420_v34, %v343_v24  ;;  %v422_v38 = vpop.f32.mrb[6].mxu0  ;;  %v445_v39 = vpack.c.bf16 %v438_v31, %v436_v30 }
 0x184   : > { %v431_v40 = vmax.f32 %v419_v33, 0.0  ;;  %v423_v41 = vadd.f32 %v422_v38, %v348_v36  ;;  %v424_v42 = vpop.f32.mrb[7].mxu0 }
 0x185   : > { %v432_v43 = vmax.f32 %v421_v37, 0.0  ;;  %v425_v44 = vadd.f32 %v424_v42, %v348_v36  ;;  %458 = vmatprep.subr.bf16.mxu1 %v445_v39 }
 0x186   : > { %v433_v45 = vmax.f32 %v423_v41, 0.0  ;;  %459 = vmatpush1.bf16.msra.mxu1 %v444_v35  ;;  %v439_v47 = vmin.f32 %v431_v40, 6.0 }
 0x187   : > { %v434_v46 = vmax.f32 %v425_v44, 0.0  ;;  %v440_v49 = vmin.f32 %v432_v43, 6.0 }
 0x188   : > { %v441_v48 = vmin.f32 %v433_v45, 6.0 }
 0x189   : > { %v442_v50 = vmin.f32 %v434_v46, 6.0 }
 0x18a   : > { %v446_v51 = vpack.c.bf16 %v441_v48, %v439_v47 }
 0x18b   : > { %v447_v52 = vpack.c.bf16 %v442_v50, %v440_v49 }
 0x18d   : > { %460 = vmatprep.subr.bf16.mxu1 %v447_v52 }
 0x18e   : > { %461 = vmatpush1.bf16.msra.mxu1 %v446_v51 }
 0x191   : > { %666 = vmatmul.mubr.msk.bf16.vlgmr.msra.gmra.mrb[0].mxu1 %vm454_vm2, %v443_v53 }
 0x264   : > { %v492_v55 = vpop.f32.mrb[0].mxu1 }
 0x265   : > { %v493_v56 = vadd.f32 %v492_v55, %v452_v54  ;;  %v494_v57 = vpop.f32.mrb[1].mxu1 }
 0x266   : > { %v495_v58 = vadd.f32 %v494_v57, %v452_v54  ;;  %v496_v59 = vpop.f32.mrb[2].mxu1 }
 0x267   : > { %v497_v60 = vpop.f32.mrb[3].mxu1 }
 0x268   : > { %v501_v61 = vcombine.low %v493_v56, %v495_v58 }
 0x26a   : > { %503 = vst [vmem:[%s312_s26] sm:$0xff] %v501_v61 }
 0x26b   : > { %942 = shalt.err (!%p939_p8)
}
 0x26c   : > { %s943_s13 = scalar_lea.hbm %s1312_s14, 128  ;;  %s947_s15 = scalar_lea.hbm %s1366_s5, 256 }
 0x26d   : > { %p944_p3 = scmp.ne.s32.totalorder %s1312_s14, %s943_s13  ;;  %p948_p13 = scmp.lt.u32.totalorder %s1312_s14, %s1366_s5 }
 0x26e   : > { %p949_p12 = scmp.lt.u32.totalorder %s947_s15, %s943_s13  ;;  %p951_p2 = scmp.lt.u32.totalorder %s943_s13, %s1312_s14 }
 0x26f   : > { %p945_p11 = pnand %p944_p3, %p1383_p9 }
 0x270   : > { %p950_p4 = por %p949_p12, %p948_p13 }
 0x271   : > { %p946_p6 = pneg %p945_p11 }
 0x272   : > { %p952_p10 = por %p951_p2, %p950_p4 }
 0x274   : > { %p953_p1 = pnand %p952_p10, %p946_p6 }
 0x276   : > { %956 = shalt.err (!%p953_p1)
}
 0x277   : > { %692 = dma.vmem_to_hbm [thread:$0]  (%p1383_p9), %s1314_s7, 128, %s1312_s14, %s505_s29  }
 0x278 PF: > { %s533_s26 = sand.u32 1, %s999_s18   ;;  %p1384_p0 = scmp.ne.s32.totalorder %s1379_s11, 0 }
 0x279   : > { %p1385_p7 = scmp.ge.s32.totalorder %s1019_s23, 2  ;;  %s534_s8 = scalar_lea.sflag [#allocation4], %s533_s26 }
 0x27b   : > { %p712_p5 = pnand %p1385_p7, %p1384_p0 }
 0x27d   : > { %994 = dma.done.wait (!%p712_p5), %s534_s8, 128  }
 0x27e   : > { %996 = vsyncadd (!%p712_p5), %s534_s8, 4294967168  ;;  %s23_s23 = sadd.s32 1, %s1019_s23   ;;  %s1386_s18 = smov %s1003_s19 }
 0x27f   : > { %p20_p8 = scmp.ge.s32.totalorder %s23_s23, 4   ;;  %s1387_s19 = smov %s1007_s20 }
 0x280   : > { %s1388_s20 = smov %s1238_s10  ;;  %s1389_s21 = smov %s1015_s22 }
 0x281   : > { %s1390_s22 = smov %s1392_s28  ;;  %22 = sbr.rel (!%p20_p8) target bundleno = 8 (0x8), region = 101 }
 0x288   :  { %539 = vsyncpa [#allocation3], 1 }
 0x289   :  { %541 = vsyncpa [#allocation3 + $0x1], 1 }
 0x28a   :  { %542 = vsyncpa [#allocation6], 1 }
 0x28b   :  { %543 = vsyncpa [#allocation9], 1 }
 0x28c   :  { %544 = vsyncpa [#allocation4], 1 }
 0x28d   :  { %546 = vsyncpa [#allocation4 + $0x1], 1 }

</bundles_post_ra>
